<compile_context>
chip_gen: v7x
topology: tpu7x:2x2x1
jax: 0.10.0
libtpu: 0.0.40
codegen_flags: <defaults>
</compile_context>

<pallas_src>
import functools
import math

import jax
import jax.numpy as jnp
import numpy as np
from jax.experimental import pallas as pl
from jax.experimental.pallas import tpu as pltpu


_SQRT_2_OVER_PI = math.sqrt(2.0 / math.pi)
_INV_SQRT2 = 1.0 / math.sqrt(2.0)


def _erf_approx(x):
    # Abramowitz & Stegun 7.1.26 (|error| <= 1.5e-7).  Uses only mul/add/exp,
    # so it lowers cleanly in Mosaic (no erf primitive required).
    p = 0.3275911
    a1, a2, a3, a4, a5 = (0.254829592, -0.284496736, 1.421413741,
                          -1.453152027, 1.061405429)
    ax = jnp.abs(x)
    t = 1.0 / (1.0 + p * ax)
    poly = ((((a5 * t + a4) * t + a3) * t + a2) * t + a1) * t
    y = 1.0 - poly * jnp.exp(-(ax * ax))
    return jnp.where(x < 0.0, -y, y)


def _gelu(x, approximate):
    if approximate:
        # tanh-GELU: transcendental goes to the EUP slot (bf16-capable on
        # v6e/v7x), leaving the VALU slots for the epilogue mul/add/cast.
        inner = _SQRT_2_OVER_PI * (x + 0.044715 * (x * x * x))
        return 0.5 * x * (1.0 + jnp.tanh(inner))
    # Exact erf-GELU (matches torch nn.GELU()).
    return 0.5 * x * (1.0 + _erf_approx(x * _INV_SQRT2))


def _convbn_kernel(x_ref, w_ref, scale_ref, shift_ref, o_ref, acc_ref, *,
                   shifts, lp_out, act, approx_gelu):
    """One grid step = (batch n, Cout-tile co, Cin-tile ci).

    x_ref:     (1, tile_cin, lp_in)            padded flattened input (compute dtype)
    w_ref:     (1, ntaps, tile_cout, tile_cin) per-tap conv weights (compute dtype)
    scale_ref: (tile_cout, 1)                  f32 BN scale  gamma/sqrt(var+eps)
    shift_ref: (tile_cout, 1)                  f32 BN shift  beta+(bias-mean)*scale
    o_ref:     (1, tile_cout, lp_out)          lane-dense output slab
    acc_ref:   (tile_cout, lp_out)             f32 accumulator (VMEM scratch)
    """
    ci = pl.program_id(2)

    @pl.when(ci == 0)
    def _init():
        acc_ref[...] = jnp.zeros_like(acc_ref)

    x = x_ref[0]                   # (tile_cin, lp_in)
    w = w_ref[0]                   # (ntaps, tile_cout, tile_cin)

    acc = acc_ref[...]
    for t, s in enumerate(shifts):
        # Static lane-offset slice selects the (kh, kw) tap window of the
        # flattened padded image; one MXU matmul per tap, f32 accumulation.
        xt = x[:, s:s + lp_out]                         # (tile_cin, lp_out)
        acc = acc + jnp.dot(w[t], xt, preferred_element_type=jnp.float32)
    acc_ref[...] = acc

    @pl.when(ci == pl.num_programs(2) - 1)
    def _finalize():
        out = acc * scale_ref[...] + shift_ref[...]     # eval-mode BN, f32
        if act == 'gelu':
            out = _gelu(out, approx_gelu)
        elif act == 'relu':
            out = jnp.maximum(out, 0.0)
        o_ref[0] = out.astype(o_ref.dtype)


def _round_up(x, m):
    return ((x + m - 1) // m) * m


def _vmem_limits():
    """Return (vmem_limit_bytes for CompilerParams, per-step buffer budget)."""
    try:
        phys = int(pltpu.get_tpu_info().vmem_capacity_bytes)
    except Exception:
        phys = 64 * 1024 * 1024          # conservative fallback = v7x per-TC
    limit = min(int(phys * 0.6), 64 * 1024 * 1024)
    budget = int(limit * 0.75)           # headroom for Mosaic internal scratch
    return limit, budget


def _tile_candidates(c):
    """Valid channel block sizes: divisors of c that are the full extent or a
    multiple of 8 (sublane granularity), largest first."""
    out = []
    for d in range(c, 0, -1):
        if c % d == 0 and (d == c or d % 8 == 0):
            out.append(d)
    return out


def _pick_channel_tiles(cout, cin, ntaps, lp_in, lp_out, in_item, out_item,
                        budget, max_tile_cout=None, max_tile_cin=None):
    """Largest (tile_cout, tile_cin) whose *full* pipelined footprint fits."""
    def fits(tco, tci):
        by = (2 * tci * lp_in * in_item            # x block, double buffered
              + 2 * ntaps * tco * tci * in_item    # w block, double buffered
              + 2 * tco * lp_out * out_item        # out block, double buffered
              + tco * lp_out * 4                   # f32 accumulator scratch
              + 4 * tco * 4)                       # scale/shift blocks
        return by <= budget

    co_c = _tile_candidates(cout)
    ci_c = _tile_candidates(cin)
    if max_tile_cout is not None:
        co_c = [d for d in co_c if d <= max_tile_cout] or [co_c[-1]]
    if max_tile_cin is not None:
        ci_c = [d for d in ci_c if d <= max_tile_cin] or [ci_c[-1]]
    for tco in co_c:          # prefer large Cout tiles (fewer re-reads of x)
        for tci in ci_c:
            if fits(tco, tci):
                return tco, tci
    return co_c[-1], ci_c[-1]


def conv_bn_forward(x_nchw, weight_oihw, bias, bn_gamma, bn_beta, bn_mean,
                    bn_var, *, stride=1, padding=0, dilation=1, eps=1e-3,
                    act='gelu', compute_dtype=jnp.float32,
                    approximate_gelu=False,
                    max_tile_cout=None, max_tile_cin=None):
    """ConvBN.forward: act(BN(Conv2d(x))).  x is NCHW like PyTorch."""
    N, Cin, H, W = x_nchw.shape
    Cout, Cin_w, KH, KW = weight_oihw.shape
    assert Cin == Cin_w, "grouped conv not supported"  # TODO(synk): depthwise.
    Hp, Wp = H + 2 * padding, W + 2 * padding
    HO = (Hp - dilation * (KH - 1) - 1) // stride + 1
    WO = (Wp - dilation * (KW - 1) - 1) // stride + 1

    ntaps = KH * KW
    # Tap (kh, kw) reads flattened padded position j + shift for output slot j.
    shifts = tuple(kh * dilation * Wp + kw * dilation
                   for kh in range(KH) for kw in range(KW))
    max_shift = shifts[-1]
    lp_out = _round_up(Hp * Wp, 128)                 # lane-dense output slab
    lp_in = _round_up(lp_out + max_shift, 128)       # + halo tail for taps

    out_dtype = x_nchw.dtype
    in_item = jnp.dtype(compute_dtype).itemsize
    out_item = jnp.dtype(out_dtype).itemsize

    vmem_limit, budget = _vmem_limits()
    tco, tci = _pick_channel_tiles(Cout, Cin, ntaps, lp_in, lp_out,
                                   in_item, out_item, budget,
                                   max_tile_cout, max_tile_cin)
    n_co, n_ci = Cout // tco, Cin // tci

    # ---- wrapper-side layout (cheap; NO patch replication) -----------------
    xp = jnp.pad(x_nchw, ((0, 0), (0, 0),
                          (padding, padding), (padding, padding)))
    x_flat = xp.reshape(N, Cin, Hp * Wp)
    x_flat = jnp.pad(x_flat, ((0, 0), (0, 0), (0, lp_in - Hp * Wp)))
    x_flat = x_flat.astype(compute_dtype)            # (N, Cin, lp_in)

    # Weights as (n_ci, ntaps, Cout, tile_cin) so the Cin-blocked dim is not on
    # the (8,128)-constrained last-two axes.
    w_taps = jnp.transpose(weight_oihw, (2, 3, 0, 1)).reshape(ntaps, Cout, Cin)
    w_blk = w_taps.reshape(ntaps, Cout, n_ci, tci).transpose(2, 0, 1, 3)
    w_blk = w_blk.astype(compute_dtype)

    if bias is None:
        bias = jnp.zeros((Cout,), jnp.float32)
    scale = (bn_gamma / jnp.sqrt(bn_var + eps)).astype(jnp.float32)
    shift = (bn_beta + (bias - bn_mean) * scale).astype(jnp.float32)
    scale2 = scale.reshape(Cout, 1)
    shift2 = shift.reshape(Cout, 1)

    kernel = functools.partial(_convbn_kernel, shifts=shifts, lp_out=lp_out,
                               act=act, approx_gelu=approximate_gelu)

    # NOTE(v7x): both TensorCores get work as long as N * n_co >= 2; the
    # reduction (Cin) axis is last and "arbitrary".
    out = pl.pallas_call(
        kernel,
        out_shape=jax.ShapeDtypeStruct((N, Cout, lp_out), out_dtype),
        grid_spec=pltpu.PrefetchScalarGridSpec(
            num_scalar_prefetch=0,
            grid=(N, n_co, n_ci),
            in_specs=[
                pl.BlockSpec((1, tci, lp_in), lambda n, co, ci: (n, ci, 0)),
                pl.BlockSpec((1, ntaps, tco, tci),
                             lambda n, co, ci: (ci, 0, co, 0)),
                pl.BlockSpec((tco, 1), lambda n, co, ci: (co, 0)),
                pl.BlockSpec((tco, 1), lambda n, co, ci: (co, 0)),
            ],
            out_specs=pl.BlockSpec((1, tco, lp_out),
                                   lambda n, co, ci: (n, co, 0)),
            scratch_shapes=[pltpu.VMEM((tco, lp_out), jnp.float32)],
        ),
        compiler_params=pltpu.CompilerParams(
            dimension_semantics=("parallel", "parallel", "arbitrary"),
            vmem_limit_bytes=vmem_limit),
    )(x_flat, w_blk, scale2, shift2)

    # Valid output positions live at (h*stride)*Wp + w*stride on the padded
    # dense grid; extraction is a cheap wrapper-side slice.
    dense = out[:, :, :Hp * Wp].reshape(N, Cout, Hp, Wp)
    return dense[:, :, 0:(HO - 1) * stride + 1:stride,
                 0:(WO - 1) * stride + 1:stride]


def _reference(x, w, bias, gamma, beta, mean, var, *, stride, padding,
               dilation, eps, act):
    cout = w.shape[0]
    y = jax.lax.conv_general_dilated(
        x, w, window_strides=(stride, stride),
        padding=((padding, padding), (padding, padding)),
        rhs_dilation=(dilation, dilation),
        dimension_numbers=('NCHW', 'OIHW', 'NCHW'))
    if bias is not None:
        y = y + bias.reshape(1, cout, 1, 1)
    y = (y - mean.reshape(1, cout, 1, 1)) / jnp.sqrt(
        var.reshape(1, cout, 1, 1) + eps)
    y = y * gamma.reshape(1, cout, 1, 1) + beta.reshape(1, cout, 1, 1)
    if act == 'gelu':
        y = jax.nn.gelu(y, approximate=False)
    elif act == 'relu':
        y = jnp.maximum(y, 0.0)
    return y


def _trunc_normal(key, shape, std):
    return std * jax.random.truncated_normal(key, -2.0, 2.0, shape, jnp.float32)


if __name__ == "__main__":
    key = jax.random.PRNGKey(0)
    keys = jax.random.split(key, 16)

    N, H, W = 2, 16, 16
    eps = 1e-3

    def make_bn(k, cout):
        k1, k2, k3, k4 = jax.random.split(k, 4)
        gamma = 1.0 + 0.1 * jax.random.normal(k1, (cout,), jnp.float32)
        beta = 0.05 * jax.random.normal(k2, (cout,), jnp.float32)
        mean = 0.1 * jax.random.normal(k3, (cout,), jnp.float32)
        var = jax.random.uniform(k4, (cout,), jnp.float32, 0.5, 1.5)
        return gamma, beta, mean, var

    x4 = jax.random.normal(keys[0], (N, 4, H, W), jnp.float32)
    x32 = jax.random.normal(keys[1], (N, 32, H, W), jnp.float32)

    configs = [
        # (x, Cin, Cout, K, stride, pad, dil, act, bias?, compute_dtype,
        #  forced (tile_cout, tile_cin) caps, tol)
        (x4, 4, 8, 3, 1, 1, 1, 'gelu', True, jnp.float32, None, 2e-3),
        (x4, 4, 8, 3, 1, 1, 1, 'gelu', True, jnp.bfloat16, None, 5e-2),
        (x4, 4, 8, 3, 2, 1, 1, 'gelu', True, jnp.float32, None, 2e-3),
        (x4, 4, 8, 1, 1, 0, 1, None, False, jnp.float32, None, 2e-3),
        (x4, 4, 8, 3, 1, 2, 2, 'relu', False, jnp.float32, None, 2e-3),
        # Exercises the Cout grid axis + the Cin reduction accumulator path.
        (x32, 32, 16, 1, 1, 0, 1, 'gelu', False, jnp.float32, (8, 8), 2e-3),
    ]

    first_shape = None
    for idx, (x, cin, cout, k, s, p, d, act, has_bias, cdt, caps, tol) \
            in enumerate(configs):
        kk = jax.random.split(keys[2 + idx], 3)
        std = math.sqrt(2.0 / cin)                    # conv_init='he_normal'
        wgt = _trunc_normal(kk[0], (cout, cin, k, k), std)
        bias = (0.02 * jax.random.normal(kk[1], (cout,), jnp.float32)
                if has_bias else None)
        gamma, beta, mean, var = make_bn(kk[2], cout)

        tco_cap, tci_cap = caps if caps is not None else (None, None)
        out = conv_bn_forward(x, wgt, bias, gamma, beta, mean, var,
                              stride=s, padding=p, dilation=d, eps=eps,
                              act=act, compute_dtype=cdt,
                              approximate_gelu=False,
                              max_tile_cout=tco_cap, max_tile_cin=tci_cap)
        out = jax.block_until_ready(out)
        ref = _reference(x, wgt, bias, gamma, beta, mean, var,
                         stride=s, padding=p, dilation=d, eps=eps, act=act)
        ref = jax.block_until_ready(ref)
        assert out.shape == ref.shape, (idx, out.shape, ref.shape)
        np.testing.assert_allclose(np.asarray(out, np.float32),
                                   np.asarray(ref, np.float32),
                                   rtol=tol, atol=tol)
        if idx == 0:
            first_shape = out.shape

    assert first_shape == (N, 8, H, W), first_shape
    print("KERNEL_OK")
</pallas_src>

<mosaic_0001>
module attributes {stable_mosaic.version = 11 : i64} {
  func.func @_convbn_kernel(%arg0: i32, %arg1: i32, %arg2: i32, %arg3: memref<1x4x512xf32, #tpu.memory_space<vmem>>, %arg4: memref<1x9x8x4xf32, #tpu.memory_space<vmem>>, %arg5: memref<8x1xf32, #tpu.memory_space<vmem>>, %arg6: memref<8x1xf32, #tpu.memory_space<vmem>>, %arg7: memref<1x8x384xf32, #tpu.memory_space<vmem>>, %arg8: memref<8x384xf32, #tpu.memory_space<vmem>>) attributes {dimension_semantics = [#tpu.dimension_semantics<parallel>, #tpu.dimension_semantics<parallel>, #tpu.dimension_semantics<arbitrary>], iteration_bounds = array<i64: 2, 1, 1>, scalar_prefetch = 0 : i64, scratch_operands = 1 : i64, tpu.core_type = #tpu.core_type<tc>, window_params = [{transform_indices = @transform_0, window_bounds = array<i64: 1, 4, 512>}, {transform_indices = @transform_1, window_bounds = array<i64: 1, 9, 8, 4>}, {transform_indices = @transform_2, window_bounds = array<i64: 8, 1>}, {transform_indices = @transform_3, window_bounds = array<i64: 8, 1>}, {transform_indices = @transform_4, window_bounds = array<i64: 1, 8, 384>}]} {
    %c0_i32 = arith.constant 0 : i32
    %0 = arith.cmpi eq, %arg2, %c0_i32 : i32
    %1 = arith.extui %0 : i1 to i32
    %c0_i32_0 = arith.constant 0 : i32
    %2 = arith.cmpi ne, %1, %c0_i32_0 : i32
    scf.if %2 {
      %cst_21 = arith.constant 0.000000e+00 : f32
      %57 = vector.broadcast %cst_21 : f32 to vector<8x384xf32>
      %c0_22 = arith.constant 0 : index
      %c0_23 = arith.constant 0 : index
      %58 = vector.load %arg8[%c0_22, %c0_23] : memref<8x384xf32, #tpu.memory_space<vmem>>, vector<8x384xf32>
      tpu.vector_store %arg8[%c0_22, %c0_23], %57 {strides = array<i32>} : memref<8x384xf32, #tpu.memory_space<vmem>>, vector<8x384xf32>,
    } else {
    }
    %c0 = arith.constant 0 : index
    %c0_1 = arith.constant 0 : index
    %c0_2 = arith.constant 0 : index
    %3 = vector.load %arg3[%c0, %c0_1, %c0_2] : memref<1x4x512xf32, #tpu.memory_space<vmem>>, vector<1x4x512xf32>
    %4 = vector.shape_cast %3 : vector<1x4x512xf32> to vector<4x512xf32>
    %c0_3 = arith.constant 0 : index
    %c0_4 = arith.constant 0 : index
    %c0_5 = arith.constant 0 : index
    %c0_6 = arith.constant 0 : index
    %5 = vector.load %arg4[%c0_3, %c0_4, %c0_5, %c0_6] : memref<1x9x8x4xf32, #tpu.memory_space<vmem>>, vector<1x9x8x4xf32>
    %6 = vector.shape_cast %5 : vector<1x9x8x4xf32> to vector<9x8x4xf32>
    %c0_7 = arith.constant 0 : index
    %c0_8 = arith.constant 0 : index
    %7 = vector.load %arg8[%c0_7, %c0_8] : memref<8x384xf32, #tpu.memory_space<vmem>>, vector<8x384xf32>
    %8 = vector.extract_strided_slice %4 {offsets = [0, 0], sizes = [4, 384], strides = [1, 1]} : vector<4x512xf32> to vector<4x384xf32>
    %9 = vector.extract_strided_slice %6 {offsets = [0, 0, 0], sizes = [1, 8, 4], strides = [1, 1, 1]} : vector<9x8x4xf32> to vector<1x8x4xf32>
    %10 = vector.shape_cast %9 : vector<1x8x4xf32> to vector<8x4xf32>
    %cst = arith.constant dense<0.000000e+00> : vector<8x384xf32>
    %11 = tpu.matmul %10, %8, %cst {dimension_numbers = #tpu.dot_dimension_numbers<[1], [0], [0], [1], [0, 0, 1, 1], [], []>} : vector<8x4xf32>, vector<4x384xf32>, vector<8x384xf32> -> vector<8x384xf32>
    %12 = arith.addf %7, %11 : vector<8x384xf32>
    %13 = vector.extract_strided_slice %4 {offsets = [0, 1], sizes = [4, 384], strides = [1, 1]} : vector<4x512xf32> to vector<4x384xf32>
    %14 = vector.extract_strided_slice %6 {offsets = [1, 0, 0], sizes = [1, 8, 4], strides = [1, 1, 1]} : vector<9x8x4xf32> to vector<1x8x4xf32>
    %15 = vector.shape_cast %14 : vector<1x8x4xf32> to vector<8x4xf32>
    %cst_9 = arith.constant dense<0.000000e+00> : vector<8x384xf32>
    %16 = tpu.matmul %15, %13, %cst_9 {dimension_numbers = #tpu.dot_dimension_numbers<[1], [0], [0], [1], [0, 0, 1, 1], [], []>} : vector<8x4xf32>, vector<4x384xf32>, vector<8x384xf32> -> vector<8x384xf32>
    %17 = arith.addf %12, %16 : vector<8x384xf32>
    %18 = vector.extract_strided_slice %4 {offsets = [0, 2], sizes = [4, 384], strides = [1, 1]} : vector<4x512xf32> to vector<4x384xf32>
    %19 = vector.extract_strided_slice %6 {offsets = [2, 0, 0], sizes = [1, 8, 4], strides = [1, 1, 1]} : vector<9x8x4xf32> to vector<1x8x4xf32>
    %20 = vector.shape_cast %19 : vector<1x8x4xf32> to vector<8x4xf32>
    %cst_10 = arith.constant dense<0.000000e+00> : vector<8x384xf32>
    %21 = tpu.matmul %20, %18, %cst_10 {dimension_numbers = #tpu.dot_dimension_numbers<[1], [0], [0], [1], [0, 0, 1, 1], [], []>} : vector<8x4xf32>, vector<4x384xf32>, vector<8x384xf32> -> vector<8x384xf32>
    %22 = arith.addf %17, %21 : vector<8x384xf32>
    %23 = vector.extract_strided_slice %4 {offsets = [0, 18], sizes = [4, 384], strides = [1, 1]} : vector<4x512xf32> to vector<4x384xf32>
    %24 = vector.extract_strided_slice %6 {offsets = [3, 0, 0], sizes = [1, 8, 4], strides = [1, 1, 1]} : vector<9x8x4xf32> to vector<1x8x4xf32>
    %25 = vector.shape_cast %24 : vector<1x8x4xf32> to vector<8x4xf32>
    %cst_11 = arith.constant dense<0.000000e+00> : vector<8x384xf32>
    %26 = tpu.matmul %25, %23, %cst_11 {dimension_numbers = #tpu.dot_dimension_numbers<[1], [0], [0], [1], [0, 0, 1, 1], [], []>} : vector<8x4xf32>, vector<4x384xf32>, vector<8x384xf32> -> vector<8x384xf32>
    %27 = arith.addf %22, %26 : vector<8x384xf32>
    %28 = vector.extract_strided_slice %4 {offsets = [0, 19], sizes = [4, 384], strides = [1, 1]} : vector<4x512xf32> to vector<4x384xf32>
    %29 = vector.extract_strided_slice %6 {offsets = [4, 0, 0], sizes = [1, 8, 4], strides = [1, 1, 1]} : vector<9x8x4xf32> to vector<1x8x4xf32>
    %30 = vector.shape_cast %29 : vector<1x8x4xf32> to vector<8x4xf32>
    %cst_12 = arith.constant dense<0.000000e+00> : vector<8x384xf32>
    %31 = tpu.matmul %30, %28, %cst_12 {dimension_numbers = #tpu.dot_dimension_numbers<[1], [0], [0], [1], [0, 0, 1, 1], [], []>} : vector<8x4xf32>, vector<4x384xf32>, vector<8x384xf32> -> vector<8x384xf32>
    %32 = arith.addf %27, %31 : vector<8x384xf32>
    %33 = vector.extract_strided_slice %4 {offsets = [0, 20], sizes = [4, 384], strides = [1, 1]} : vector<4x512xf32> to vector<4x384xf32>
    %34 = vector.extract_strided_slice %6 {offsets = [5, 0, 0], sizes = [1, 8, 4], strides = [1, 1, 1]} : vector<9x8x4xf32> to vector<1x8x4xf32>
    %35 = vector.shape_cast %34 : vector<1x8x4xf32> to vector<8x4xf32>
    %cst_13 = arith.constant dense<0.000000e+00> : vector<8x384xf32>
    %36 = tpu.matmul %35, %33, %cst_13 {dimension_numbers = #tpu.dot_dimension_numbers<[1], [0], [0], [1], [0, 0, 1, 1], [], []>} : vector<8x4xf32>, vector<4x384xf32>, vector<8x384xf32> -> vector<8x384xf32>
    %37 = arith.addf %32, %36 : vector<8x384xf32>
    %38 = vector.extract_strided_slice %4 {offsets = [0, 36], sizes = [4, 384], strides = [1, 1]} : vector<4x512xf32> to vector<4x384xf32>
    %39 = vector.extract_strided_slice %6 {offsets = [6, 0, 0], sizes = [1, 8, 4], strides = [1, 1, 1]} : vector<9x8x4xf32> to vector<1x8x4xf32>
    %40 = vector.shape_cast %39 : vector<1x8x4xf32> to vector<8x4xf32>
    %cst_14 = arith.constant dense<0.000000e+00> : vector<8x384xf32>
    %41 = tpu.matmul %40, %38, %cst_14 {dimension_numbers = #tpu.dot_dimension_numbers<[1], [0], [0], [1], [0, 0, 1, 1], [], []>} : vector<8x4xf32>, vector<4x384xf32>, vector<8x384xf32> -> vector<8x384xf32>
    %42 = arith.addf %37, %41 : vector<8x384xf32>
    %43 = vector.extract_strided_slice %4 {offsets = [0, 37], sizes = [4, 384], strides = [1, 1]} : vector<4x512xf32> to vector<4x384xf32>
    %44 = vector.extract_strided_slice %6 {offsets = [7, 0, 0], sizes = [1, 8, 4], strides = [1, 1, 1]} : vector<9x8x4xf32> to vector<1x8x4xf32>
    %45 = vector.shape_cast %44 : vector<1x8x4xf32> to vector<8x4xf32>
    %cst_15 = arith.constant dense<0.000000e+00> : vector<8x384xf32>
    %46 = tpu.matmul %45, %43, %cst_15 {dimension_numbers = #tpu.dot_dimension_numbers<[1], [0], [0], [1], [0, 0, 1, 1], [], []>} : vector<8x4xf32>, vector<4x384xf32>, vector<8x384xf32> -> vector<8x384xf32>
    %47 = arith.addf %42, %46 : vector<8x384xf32>
    %48 = vector.extract_strided_slice %4 {offsets = [0, 38], sizes = [4, 384], strides = [1, 1]} : vector<4x512xf32> to vector<4x384xf32>
    %49 = vector.extract_strided_slice %6 {offsets = [8, 0, 0], sizes = [1, 8, 4], strides = [1, 1, 1]} : vector<9x8x4xf32> to vector<1x8x4xf32>
    %50 = vector.shape_cast %49 : vector<1x8x4xf32> to vector<8x4xf32>
    %cst_16 = arith.constant dense<0.000000e+00> : vector<8x384xf32>
    %51 = tpu.matmul %50, %48, %cst_16 {dimension_numbers = #tpu.dot_dimension_numbers<[1], [0], [0], [1], [0, 0, 1, 1], [], []>} : vector<8x4xf32>, vector<4x384xf32>, vector<8x384xf32> -> vector<8x384xf32>
    %52 = arith.addf %47, %51 : vector<8x384xf32>
    %c0_17 = arith.constant 0 : index
    %c0_18 = arith.constant 0 : index
    %53 = vector.load %arg8[%c0_17, %c0_18] : memref<8x384xf32, #tpu.memory_space<vmem>>, vector<8x384xf32>
    tpu.vector_store %arg8[%c0_17, %c0_18], %52 {strides = array<i32>} : memref<8x384xf32, #tpu.memory_space<vmem>>, vector<8x384xf32>,
    %c0_i32_19 = arith.constant 0 : i32
    %54 = arith.cmpi eq, %arg2, %c0_i32_19 : i32
    %55 = arith.extui %54 : i1 to i32
    %c0_i32_20 = arith.constant 0 : i32
    %56 = arith.cmpi ne, %55, %c0_i32_20 : i32
    scf.if %56 {
      %c0_21 = arith.constant 0 : index
      %c0_22 = arith.constant 0 : index
      %57 = vector.load %arg5[%c0_21, %c0_22] : memref<8x1xf32, #tpu.memory_space<vmem>>, vector<8x1xf32>
      %58 = vector.broadcast %57 : vector<8x1xf32> to vector<8x384xf32>
      %59 = arith.mulf %52, %58 : vector<8x384xf32>
      %c0_23 = arith.constant 0 : index
      %c0_24 = arith.constant 0 : index
      %60 = vector.load %arg6[%c0_23, %c0_24] : memref<8x1xf32, #tpu.memory_space<vmem>>, vector<8x1xf32>
      %61 = vector.broadcast %60 : vector<8x1xf32> to vector<8x384xf32>
      %62 = arith.addf %59, %61 : vector<8x384xf32>
      %cst_25 = arith.constant 5.000000e-01 : f32
      %63 = vector.broadcast %cst_25 : f32 to vector<8x384xf32>
      %64 = arith.mulf %63, %62 : vector<8x384xf32>
      %cst_26 = arith.constant 0.707106769 : f32
      %65 = vector.broadcast %cst_26 : f32 to vector<8x384xf32>
      %66 = arith.mulf %62, %65 : vector<8x384xf32>
      %67 = math.absf %66 : vector<8x384xf32>
      %cst_27 = arith.constant 0.327591091 : f32
      %68 = vector.broadcast %cst_27 : f32 to vector<8x384xf32>
      %69 = arith.mulf %68, %67 : vector<8x384xf32>
      %cst_28 = arith.constant 1.000000e+00 : f32
      %70 = vector.broadcast %cst_28 : f32 to vector<8x384xf32>
      %71 = arith.addf %70, %69 : vector<8x384xf32>
      %cst_29 = arith.constant 1.000000e+00 : f32
      %72 = vector.broadcast %cst_29 : f32 to vector<8x384xf32>
      %73 = arith.divf %72, %71 : vector<8x384xf32>
      %cst_30 = arith.constant 1.06140542 : f32
      %74 = vector.broadcast %cst_30 : f32 to vector<8x384xf32>
      %75 = arith.mulf %74, %73 : vector<8x384xf32>
      %cst_31 = arith.constant -1.45315206 : f32
      %76 = vector.broadcast %cst_31 : f32 to vector<8x384xf32>
      %77 = arith.addf %75, %76 : vector<8x384xf32>
      %78 = arith.mulf %77, %73 : vector<8x384xf32>
      %cst_32 = arith.constant 1.42141378 : f32
      %79 = vector.broadcast %cst_32 : f32 to vector<8x384xf32>
      %80 = arith.addf %78, %79 : vector<8x384xf32>
      %81 = arith.mulf %80, %73 : vector<8x384xf32>
      %cst_33 = arith.constant -0.284496725 : f32
      %82 = vector.broadcast %cst_33 : f32 to vector<8x384xf32>
      %83 = arith.addf %81, %82 : vector<8x384xf32>
      %84 = arith.mulf %83, %73 : vector<8x384xf32>
      %cst_34 = arith.constant 0.254829586 : f32
      %85 = vector.broadcast %cst_34 : f32 to vector<8x384xf32>
      %86 = arith.addf %84, %85 : vector<8x384xf32>
      %87 = arith.mulf %86, %73 : vector<8x384xf32>
      %88 = arith.mulf %67, %67 : vector<8x384xf32>
      %cst_35 = arith.constant 0.000000e+00 : f32
      %89 = vector.broadcast %cst_35 : f32 to vector<8x384xf32>
      %90 = arith.subf %89, %88 : vector<8x384xf32>
      %91 = math.exp %90 : vector<8x384xf32>
      %92 = arith.mulf %87, %91 : vector<8x384xf32>
      %cst_36 = arith.constant 1.000000e+00 : f32
      %93 = vector.broadcast %cst_36 : f32 to vector<8x384xf32>
      %94 = arith.subf %93, %92 : vector<8x384xf32>
      %cst_37 = arith.constant 0.000000e+00 : f32
      %95 = vector.broadcast %cst_37 : f32 to vector<8x384xf32>
      %96 = arith.cmpf olt, %66, %95 : vector<8x384xf32>
      %cst_38 = arith.constant 0.000000e+00 : f32
      %97 = vector.broadcast %cst_38 : f32 to vector<8x384xf32>
      %98 = arith.subf %97, %94 : vector<8x384xf32>
      %99 = arith.select %96, %98, %94 : vector<8x384xi1>, vector<8x384xf32>
      %cst_39 = arith.constant 1.000000e+00 : f32
      %100 = vector.broadcast %cst_39 : f32 to vector<8x384xf32>
      %101 = arith.addf %100, %99 : vector<8x384xf32>
      %102 = arith.mulf %64, %101 : vector<8x384xf32>
      %c0_40 = arith.constant 0 : index
      %c0_41 = arith.constant 0 : index
      %c0_42 = arith.constant 0 : index
      %103 = vector.load %arg7[%c0_40, %c0_41, %c0_42] : memref<1x8x384xf32, #tpu.memory_space<vmem>>, vector<1x8x384xf32>
      %104 = vector.shape_cast %103 : vector<1x8x384xf32> to vector<8x384xf32>
      %105 = vector.shape_cast %102 : vector<8x384xf32> to vector<1x8x384xf32>
      tpu.vector_store %arg7[%c0_40, %c0_41, %c0_42], %105 {strides = array<i32>} : memref<1x8x384xf32, #tpu.memory_space<vmem>>, vector<1x8x384xf32>,
    } else {
    }
    return
  }
  func.func @transform_0(%arg0: i32, %arg1: i32, %arg2: i32) -> (i32, i32, i32) {
    %c0_i32 = arith.constant 0 : i32
    %c0_i32_0 = arith.constant 0 : i32
    return %arg0, %arg2, %c0_i32 : i32, i32, i32
  }
  func.func @transform_1(%arg0: i32, %arg1: i32, %arg2: i32) -> (i32, i32, i32, i32) {
    %c0_i32 = arith.constant 0 : i32
    %c0_i32_0 = arith.constant 0 : i32
    %c0_i32_1 = arith.constant 0 : i32
    return %arg2, %c0_i32, %arg1, %c0_i32_0 : i32, i32, i32, i32
  }
  func.func @transform_2(%arg0: i32, %arg1: i32, %arg2: i32) -> (i32, i32) {
    %c0_i32 = arith.constant 0 : i32
    %c0_i32_0 = arith.constant 0 : i32
    return %arg1, %c0_i32 : i32, i32
  }
  func.func @transform_3(%arg0: i32, %arg1: i32, %arg2: i32) -> (i32, i32) {
    %c0_i32 = arith.constant 0 : i32
    %c0_i32_0 = arith.constant 0 : i32
    return %arg1, %c0_i32 : i32, i32
  }
  func.func @transform_4(%arg0: i32, %arg1: i32, %arg2: i32) -> (i32, i32, i32) {
    %c0_i32 = arith.constant 0 : i32
    %c0_i32_0 = arith.constant 0 : i32
    return %arg0, %arg1, %c0_i32 : i32, i32, i32
  }
}

</mosaic_0001>

<bundles_post_ra>
// kernel: tpu_custom_call.1
= control target key start
LH: loop header
LB: loop body
LE: loop exit
PB: predicated region body
PF: predicated region fallthrough
CT: control target
= control target key end

     0   :  { %9 = vsyncpa [#allocation4], 0  ;;  %s2663_s0 = inlined_call_operand.vmem [shape: f32[2,4,512], index: 0, kind: input, shape index: {}]   ;;  %s2664_s1 = inlined_call_operand.vmem [shape: f32[1,9,8,4], index: 1, kind: input, shape index: {}]   ;;  %s2665_s2 = inlined_call_operand.vmem [shape: f32[8,1], index: 2, kind: input, shape index: {}]   ;;  %s2666_s3 = inlined_call_operand.vmem [shape: f32[8,1], index: 3, kind: input, shape index: {}]   ;;  %s2667_s4 = inlined_call_operand.hbm [shape: f32[2,8,384], index: 4, kind: output, shape index: {}]  }
   0x1   :  { %11 = vsyncpa [#allocation4 + $0x1], 0  ;;  %s2409_s15 = smov 0   ;;  %s2411_s16 = smov 0  }
   0x2   :  { %s2413_s17 = smov 0   ;;  %s2415_s18 = smov 0  }
   0x3   :  { %s2417_s19 = smov 0   ;;  %s2419_s20 = smov 0  }
   0x4 LB: > { %s2054_s21 = sadd.s32 4294967295, %s2370_s20   ;;  %s2055_s22 = sadd.s32 4294967294, %s2370_s20   ;;  %s2370_s20 = sphi %s2419_s20, %s17_s20   ;;  %s2366_s19 = sphi %s2417_s19, %s2674_s19   ;;  %s2362_s18 = sphi %s2415_s18, %s2673_s18   ;;  %s2358_s17 = sphi %s2413_s17, %s2672_s17   ;;  %s2354_s16 = sphi %s2411_s16, %s2671_s16   ;;  %s2350_s15 = sphi %s2409_s15, %s2670_s15  }
   0x5   : > { %s36_s23 = sadd.s32 1, %s2366_s19  ;;  %s153_s24 = sadd.s32 1, %s2358_s17 }
   0x6   : > { %p38_p0 = scmp.ge.s32.totalorder %s36_s23, 2  ;;  %p163_p1 = scmp.ne.s32.totalorder %s2358_s17, %s2354_s16 }
   0x7   : > { %p164_p2 = scmp.eq.s32.totalorder %s2054_s21, 1  ;;  %p169_p3 = scmp.ne.s32.totalorder %s2354_s16, %s2350_s15 }
   0x8   : > { %s2676_s23 = smov (%p38_p0, %s36_s23), 0  ;;  %p170_p5 = scmp.eq.s32.totalorder %s2055_s22, 1 }
   0x9   : > { %p2449_p4 = por %p164_p2, %p163_p1  ;;  %s148_s26 = ssub.s32 %s2366_s19, %s2676_s23 }
   0xa   : > { %p2061_p6 = scmp.ge.s32.totalorder %s2370_s20, 1  ;;  %p151_p7 = scmp.eq.s32.totalorder %s148_s26, 0 }
   0xb   : > { %p2456_p8 = por %p170_p5, %p169_p3  ;;  %p225_p9 = scmp.lt.s32.totalorder %s2370_s20, 3 }
   0xc   : > { %s2462_s28 = scalar_select %p151_p7, %s2358_s17, %s153_s24  }
   0xd   : > { %p226_p10 = pnand %p2061_p6, %p225_p9 }
   0xe   : > { %p271_p11 = scmp.lt.s32.totalorder (!%p226_p10), %s2362_s18, 1  ;;  %v2372_v0 = vmov (!%p226_p10), 0.0   ;;  %vm2373_vm0 = vmmov (!%p226_p10), 0   ;;  %vm324_vm1 = vcmask (!%p226_p10), 1043456   ;;  %v305_v1 = vld [vmem:[%s2664_s1] sm:$0xff] (!%p226_p10)  ;;  %vm320_vm2 = vcmask (!%p226_p10), 31744  }
   0xf   : > { %229 = sbr.rel (%p226_p10) target bundleno = 486 (0x1e6), region = 36  ;;  %2131 = vmatprep.subr.mxu1 (!%p226_p10), %v2372_v0  ;;  %2133 = vmatprep.mubr.msk.f32.mxu1 (!%p226_p10), %vm2373_vm0, %v2372_v0  ;;  %s2374_s10 = smov (!%p226_p10), 127   ;;  %v2381_v6 = vmov (!%p226_p10), 0   ;;  %v1811_v7 = vld [vmem:[%s2666_s3] sm:$0xff] (!%p226_p10)  ;;  %vm484_vm3 = vcmask (!%p226_p10), 1039360   ;;  %v306_v13 = vld [vmem:[%s2664_s1 + $0x8] sm:$0xff] (!%p226_p10) }
  0x10   : > { %395 = vmatprep.mubr.f32.mxu0 (!%p226_p10), %v2372_v0  ;;  %s2375_s11 = smov (!%p226_p10), 126   ;;  %s2376_s12 = smov (!%p226_p10), 110   ;;  %2276 = vset.pattern.permute.xlu0 (!%p226_p10), %v2381_v6  ;;  %v1802_v8 = vld [vmem:[%s2665_s2] sm:$0xff] (!%p226_p10)  ;;  %vm649_vm4 = vcmask (!%p226_p10), 1031168   ;;  %v307_v23 = vld [vmem:[%s2664_s1 + $0x10] sm:$0xff] (!%p226_p10)  ;;  %vm814_vm5 = vcmask (!%p226_p10), 900096  }
  0x11   : > { %s2377_s13 = smov (!%p226_p10), 109   ;;  %s2378_s14 = smov (!%p226_p10), 108   ;;  %2277 = vset.pattern.permute.xlu1 (!%p226_p10), %v2381_v6  ;;  %v308_v31 = vld [vmem:[%s2664_s1 + $0x18] sm:$0xff] (!%p226_p10)  ;;  %vm979_vm6 = vcmask (!%p226_p10), 891904   ;;  %v309_v39 = vld [vmem:[%s2664_s1 + $0x20] sm:$0xff] (!%p226_p10)  ;;  %vm1144_vm7 = vcmask (!%p226_p10), 883712  }
  0x12   : > { %s2379_s21 = smov (!%p226_p10), 92   ;;  %s2380_s22 = smov (!%p226_p10), 91   ;;  %v310_v47 = vld [vmem:[%s2664_s1 + $0x28] sm:$0xff] (!%p226_p10)  ;;  %vm1309_vm8 = vcmask (!%p226_p10), 752640   ;;  %v311_v55 = vld [vmem:[%s2664_s1 + $0x30] sm:$0xff] (!%p226_p10)  ;;  %vm1474_vm9 = vcmask (!%p226_p10), 744448  }
  0x13   : > { %s2382_s24 = smov (!%p226_p10), 90   ;;  %v312_v63 = vld [vmem:[%s2664_s1 + $0x38] sm:$0xff] (!%p226_p10)  ;;  %vm1639_vm10 = vcmask (!%p226_p10), 736256   ;;  %s268_s6 = sand.u32 (!%p226_p10), 1, %s2354_s16  }
  0x14   : > { %s2209_s8 = smul.u32 (!%p226_p10), 384, %s2362_s18 }
  0x16   : > { %s272_s29 = scalar_select %p271_p11, %s2362_s18, 1 }
  0x17   : > { %s1905_s18 = scalar_lea.sflag [#allocation4], %s268_s6 }
  0x18   : > { %s2112_s30 = sshll.u32 %s272_s29, 4 }
  0x19   : > { %s279_s7 = scalar_lea.vmem %s2663_s0, %s2112_s30 }
  0x1a   : > { %v303_v2 = vld [vmem:[%s279_s7] sm:$0xff]  ;;  %v304_v3 = vld [vmem:[%s279_s7 + $0x8] sm:$0xff]  ;;  %s2208_s7 = smul.u32 24, %s268_s6 }
  0x1b   : > { %476 = vrot.lane.b32.xlu1 %v303_v2, %s2374_s10  ;;  %v319_v4 = vcombine.high %v303_v2, %v303_v2  ;;  %v475_v5 = vcombine.high %v304_v3, %v304_v3  ;;  %2132 = vmatpush3.msk.msra.mxu1 %vm324_vm1, %v304_v3 }
  0x1c   : > { %2134 = vmatmul.mubr.msk.f32.vlgmr.msra.gmra.mrb[0].mxu1 %vm320_vm2, %v305_v1  ;;  %2136 = vmatprep.subr.mxu1 %v2372_v0  ;;  %s270_s9 = scalar_lea.vmem [#allocation3], %s2208_s7 }
  0x1d   : > { %478 = vrot.lane.b32.xlu0 %v319_v4, %s2374_s10  ;;  %2064 = vmatprep.subr.msk.mxu0 %vm324_vm1, %v319_v4 }
  0x1e   : > { %2065 = vmatpush1.msk.msra.mxu0 %vm324_vm1, %v303_v2  ;;  %2138 = vmatprep.mubr.msk.f32.mxu1 %vm2373_vm0, %v2372_v0 }
  0x1f   : > { %482 = vrot.lane.b32.xlu1 %v475_v5, %s2374_s10  ;;  %2066 = vmatmul.mubr.msk.f32.vlgmr.msra.gmra.mrb[0].mxu0 %vm320_vm2, %v305_v1 }
  0x20   : > { %561 = vmatprep.mubr.f32.mxu0 %v2372_v0 }
  0x21   : > { %480 = vrot.lane.b32.xlu0 %v304_v3, %s2374_s10  ;;  %s1921_s10 = sshll.u32 %s270_s9, 4  ;;  %s2616_s10 = int_to_ptr.vmem [resolvable:$true] %s1921_s10 }
  0x23   : > { %645 = vrot.lane.b32.xlu1 %v304_v3, %s2375_s11 }
  0x25   : > { %643 = vrot.lane.b32.xlu0 %v319_v4, %s2375_s11 }
  0x27   : > { %647 = vrot.lane.b32.xlu1 %v475_v5, %s2375_s11 }
  0x29   : > { %641 = vrot.lane.b32.xlu0 %v303_v2, %s2375_s11 }
  0x2b   : > { %810 = vrot.lane.b32.xlu1 %v304_v3, %s2376_s12 }
  0x2d   : > { %808 = vrot.lane.b32.xlu0 %v319_v4, %s2376_s12 }
  0x2f   : > { %812 = vrot.lane.b32.xlu1 %v475_v5, %s2376_s12 }
  0x31   : > { %806 = vrot.lane.b32.xlu0 %v303_v2, %s2376_s12 }
  0x33   : > { %975 = vrot.lane.b32.xlu1 %v304_v3, %s2377_s13 }
  0x35   : > { %973 = vrot.lane.b32.xlu0 %v319_v4, %s2377_s13 }
  0x37   : > { %977 = vrot.lane.b32.xlu1 %v475_v5, %s2377_s13 }
  0x39   : > { %971 = vrot.lane.b32.xlu0 %v303_v2, %s2377_s13  ;;  %s2614_s13 = scalar_lea.hbm %s2667_s4, %s2209_s8 }
  0x3b   : > { %1140 = vrot.lane.b32.xlu1 %v304_v3, %s2378_s14 }
  0x3d   : > { %1138 = vrot.lane.b32.xlu0 %v319_v4, %s2378_s14 }
  0x3f   : > { %1142 = vrot.lane.b32.xlu1 %v475_v5, %s2378_s14 }
  0x41   : > { %1136 = vrot.lane.b32.xlu0 %v303_v2, %s2378_s14  ;;  %s2292_s14 = scalar_lea.vmem %s2616_s10, 384 }
  0x42   : > { %p2293_p12 = scmp.ne.s32.totalorder %s2616_s10, %s2292_s14 }
  0x43   : > { %1305 = vrot.lane.b32.xlu1 %v304_v3, %s2379_s21 }
  0x44   : > { %p2294_p13 = pnand %p2293_p12, %p2449_p4 }
  0x45   : > { %1303 = vrot.lane.b32.xlu0 %v319_v4, %s2379_s21 }
  0x46   : > { %p2295_p0 = pneg %p2294_p13 }
  0x47   : > { %1307 = vrot.lane.b32.xlu1 %v475_v5, %s2379_s21 }
  0x49   : > { %1301 = vrot.lane.b32.xlu0 %v303_v2, %s2379_s21  ;;  %s2383_s21 = smov [#allocation3]  }
  0x4b   : > { %1470 = vrot.lane.b32.xlu1 %v304_v3, %s2380_s22 }
  0x4d   : > { %1468 = vrot.lane.b32.xlu0 %v319_v4, %s2380_s22 }
  0x4f   : > { %1472 = vrot.lane.b32.xlu1 %v475_v5, %s2380_s22 }
  0x51   : > { %1466 = vrot.lane.b32.xlu0 %v303_v2, %s2380_s22  ;;  %s2296_s22 = sshll.u32 %s2383_s21, 4  ;;  %s2297_s22 = int_to_ptr.vmem [resolvable:$false] %s2296_s22 }
  0x52   : > { %p2299_p1 = scmp.lt.s32.totalorder %s2616_s10, %s2297_s22 }
  0x53   : > { %1635 = vrot.lane.b32.xlu1 %v304_v3, %s2382_s24 }
  0x55   : > { %1633 = vrot.lane.b32.xlu0 %v319_v4, %s2382_s24 }
  0x57   : > { %1637 = vrot.lane.b32.xlu1 %v475_v5, %s2382_s24 }
  0x59   : > { %1631 = vrot.lane.b32.xlu0 %v303_v2, %s2382_s24  ;;  %s2298_s24 = scalar_lea.vmem %s2297_s22, 768 }
  0x5a   : > { %p2300_p2 = scmp.lt.s32.totalorder %s2298_s24, %s2292_s14 }
  0x5b   : > { %1814 = vperm.xlu1 %2277, %v1811_v7  }
  0x5c   : > { %p2301_p3 = por %p2300_p2, %p2299_p1 }
  0x5d   : > { %1805 = vperm.xlu0 %2276, %v1802_v8   ;;  %v313_v8 = vld [vmem:[%s2664_s1 + $0x40] sm:$0xff] }
  0x5e   : > { %p2302_p5 = pnand %p2301_p3, %p2295_p0 }
  0x8d   : > { %v477_v9 = vpop.permute.xlu1 %476 }
  0x8f   : > { %v479_v10 = vpop.permute.xlu0 %478 }
  0x90   : > { %v485_v16 = vsel %vm484_vm3, %v477_v9, %v479_v10 }
  0x91   : > { %v483_v11 = vpop.permute.xlu1 %482 }
  0x93   : > { %v481_v12 = vpop.permute.xlu0 %480 }
  0x94   : > { %v486_v14 = vsel %vm484_vm3, %v479_v10, %v481_v12  ;;  %v487_v15 = vsel %vm484_vm3, %v481_v12, %v483_v11 }
  0x95   : > { %v646_v17 = vpop.permute.xlu1 %645  ;;  %2069 = vmatprep.subr.msk.mxu0 %vm324_vm1, %v486_v14  ;;  %2137 = vmatpush3.msk.msra.mxu1 %vm324_vm1, %v487_v15 }
  0x96   : > { %2070 = vmatpush1.msk.msra.mxu0 %vm324_vm1, %v485_v16  ;;  %2139 = vmatmul.mubr.msk.f32.vlgmr.msra.gmra.mrb[0].mxu1 %vm320_vm2, %v306_v13 }
  0x97   : > { %v644_v18 = vpop.permute.xlu0 %643  ;;  %2071 = vmatmul.mubr.msk.f32.vlgmr.msra.gmra.mrb[0].mxu0 %vm320_vm2, %v306_v13  ;;  %2141 = vmatprep.subr.mxu1 %v2372_v0 }
  0x98   : > { %v651_v19 = vsel %vm649_vm4, %v644_v18, %v646_v17  ;;  %2143 = vmatprep.mubr.msk.f32.mxu1 %vm2373_vm0, %v2372_v0  ;;  %726 = vmatprep.mubr.f32.mxu0 %v2372_v0 }
  0x99   : > { %v648_v20 = vpop.permute.xlu1 %647  ;;  %2074 = vmatprep.subr.msk.mxu0 %vm324_vm1, %v651_v19 }
  0x9a   : > { %v652_v21 = vsel %vm649_vm4, %v646_v17, %v648_v20 }
  0x9b   : > { %2142 = vmatpush3.msk.msra.mxu1 %vm324_vm1, %v652_v21  ;;  %v642_v22 = vpop.permute.xlu0 %641 }
  0x9c   : > { %v650_v24 = vsel %vm649_vm4, %v642_v22, %v644_v18  ;;  %2146 = vmatprep.subr.mxu1 %v2372_v0 }
  0x9d   : > { %v811_v25 = vpop.permute.xlu1 %810  ;;  %2075 = vmatpush1.msk.msra.mxu0 %vm324_vm1, %v650_v24 }
  0x9e   : > { %2144 = vmatmul.mubr.msk.f32.vlgmr.msra.gmra.mrb[0].mxu1 %vm320_vm2, %v307_v23 }
  0x9f   : > { %v809_v26 = vpop.permute.xlu0 %808  ;;  %2076 = vmatmul.mubr.msk.f32.vlgmr.msra.gmra.mrb[0].mxu0 %vm320_vm2, %v307_v23  ;;  %2148 = vmatprep.mubr.msk.f32.mxu1 %vm2373_vm0, %v2372_v0 }
  0xa0   : > { %v816_v27 = vsel %vm814_vm5, %v809_v26, %v811_v25  ;;  %891 = vmatprep.mubr.f32.mxu0 %v2372_v0 }
  0xa1   : > { %v813_v28 = vpop.permute.xlu1 %812  ;;  %2079 = vmatprep.subr.msk.mxu0 %vm324_vm1, %v816_v27 }
  0xa2   : > { %v817_v29 = vsel %vm814_vm5, %v811_v25, %v813_v28 }
  0xa3   : > { %2147 = vmatpush3.msk.msra.mxu1 %vm324_vm1, %v817_v29  ;;  %v807_v30 = vpop.permute.xlu0 %806 }
  0xa4   : > { %v815_v32 = vsel %vm814_vm5, %v807_v30, %v809_v26  ;;  %2151 = vmatprep.subr.mxu1 %v2372_v0 }
  0xa5   : > { %v976_v33 = vpop.permute.xlu1 %975  ;;  %2080 = vmatpush1.msk.msra.mxu0 %vm324_vm1, %v815_v32 }
  0xa6   : > { %2149 = vmatmul.mubr.msk.f32.vlgmr.msra.gmra.mrb[0].mxu1 %vm320_vm2, %v308_v31 }
  0xa7   : > { %v974_v34 = vpop.permute.xlu0 %973  ;;  %2081 = vmatmul.mubr.msk.f32.vlgmr.msra.gmra.mrb[0].mxu0 %vm320_vm2, %v308_v31  ;;  %2153 = vmatprep.mubr.msk.f32.mxu1 %vm2373_vm0, %v2372_v0 }
  0xa8   : > { %v981_v35 = vsel %vm979_vm6, %v974_v34, %v976_v33  ;;  %1056 = vmatprep.mubr.f32.mxu0 %v2372_v0 }
  0xa9   : > { %v978_v36 = vpop.permute.xlu1 %977  ;;  %2084 = vmatprep.subr.msk.mxu0 %vm324_vm1, %v981_v35 }
  0xaa   : > { %v982_v37 = vsel %vm979_vm6, %v976_v33, %v978_v36 }
  0xab   : > { %2152 = vmatpush3.msk.msra.mxu1 %vm324_vm1, %v982_v37  ;;  %v972_v38 = vpop.permute.xlu0 %971 }
  0xac   : > { %v980_v40 = vsel %vm979_vm6, %v972_v38, %v974_v34  ;;  %2156 = vmatprep.subr.mxu1 %v2372_v0 }
  0xad   : > { %v1141_v41 = vpop.permute.xlu1 %1140  ;;  %2085 = vmatpush1.msk.msra.mxu0 %vm324_vm1, %v980_v40 }
  0xae   : > { %2154 = vmatmul.mubr.msk.f32.vlgmr.msra.gmra.mrb[0].mxu1 %vm320_vm2, %v309_v39 }
  0xaf   : > { %v1139_v42 = vpop.permute.xlu0 %1138  ;;  %2086 = vmatmul.mubr.msk.f32.vlgmr.msra.gmra.mrb[0].mxu0 %vm320_vm2, %v309_v39  ;;  %2158 = vmatprep.mubr.msk.f32.mxu1 %vm2373_vm0, %v2372_v0 }
  0xb0   : > { %v1146_v43 = vsel %vm1144_vm7, %v1139_v42, %v1141_v41  ;;  %1221 = vmatprep.mubr.f32.mxu0 %v2372_v0 }
  0xb1   : > { %v1143_v44 = vpop.permute.xlu1 %1142  ;;  %2089 = vmatprep.subr.msk.mxu0 %vm324_vm1, %v1146_v43 }
  0xb2   : > { %v1147_v45 = vsel %vm1144_vm7, %v1141_v41, %v1143_v44 }
  0xb3   : > { %2157 = vmatpush3.msk.msra.mxu1 %vm324_vm1, %v1147_v45  ;;  %v1137_v46 = vpop.permute.xlu0 %1136 }
  0xb4   : > { %v1145_v48 = vsel %vm1144_vm7, %v1137_v46, %v1139_v42  ;;  %2161 = vmatprep.subr.mxu1 %v2372_v0 }
  0xb5   : > { %v1306_v49 = vpop.permute.xlu1 %1305  ;;  %2090 = vmatpush1.msk.msra.mxu0 %vm324_vm1, %v1145_v48 }
  0xb6   : > { %2159 = vmatmul.mubr.msk.f32.vlgmr.msra.gmra.mrb[0].mxu1 %vm320_vm2, %v310_v47 }
  0xb7   : > { %v1304_v50 = vpop.permute.xlu0 %1303  ;;  %2091 = vmatmul.mubr.msk.f32.vlgmr.msra.gmra.mrb[0].mxu0 %vm320_vm2, %v310_v47  ;;  %2163 = vmatprep.mubr.msk.f32.mxu1 %vm2373_vm0, %v2372_v0 }
  0xb8   : > { %v1311_v51 = vsel %vm1309_vm8, %v1304_v50, %v1306_v49  ;;  %1386 = vmatprep.mubr.f32.mxu0 %v2372_v0 }
  0xb9   : > { %v1308_v52 = vpop.permute.xlu1 %1307  ;;  %2094 = vmatprep.subr.msk.mxu0 %vm324_vm1, %v1311_v51 }
  0xba   : > { %v1312_v53 = vsel %vm1309_vm8, %v1306_v49, %v1308_v52 }
  0xbb   : > { %2162 = vmatpush3.msk.msra.mxu1 %vm324_vm1, %v1312_v53  ;;  %v1302_v54 = vpop.permute.xlu0 %1301 }
  0xbc   : > { %v1310_v56 = vsel %vm1309_vm8, %v1302_v54, %v1304_v50  ;;  %2166 = vmatprep.subr.mxu1 %v2372_v0 }
  0xbd   : > { %v1471_v57 = vpop.permute.xlu1 %1470  ;;  %2095 = vmatpush1.msk.msra.mxu0 %vm324_vm1, %v1310_v56 }
  0xbe   : > { %2164 = vmatmul.mubr.msk.f32.vlgmr.msra.gmra.mrb[0].mxu1 %vm320_vm2, %v311_v55 }
  0xbf   : > { %v1469_v58 = vpop.permute.xlu0 %1468  ;;  %2096 = vmatmul.mubr.msk.f32.vlgmr.msra.gmra.mrb[0].mxu0 %vm320_vm2, %v311_v55  ;;  %2168 = vmatprep.mubr.msk.f32.mxu1 %vm2373_vm0, %v2372_v0 }
  0xc0   : > { %v1476_v59 = vsel %vm1474_vm9, %v1469_v58, %v1471_v57  ;;  %1551 = vmatprep.mubr.f32.mxu0 %v2372_v0 }
  0xc1   : > { %v1473_v60 = vpop.permute.xlu1 %1472  ;;  %2099 = vmatprep.subr.msk.mxu0 %vm324_vm1, %v1476_v59 }
  0xc2   : > { %v1477_v61 = vsel %vm1474_vm9, %v1471_v57, %v1473_v60 }
  0xc3   : > { %2167 = vmatpush3.msk.msra.mxu1 %vm324_vm1, %v1477_v61  ;;  %v1467_v62 = vpop.permute.xlu0 %1466 }
  0xc4   : > { %v1475_v1 = vsel %vm1474_vm9, %v1467_v62, %v1469_v58  ;;  %2171 = vmatprep.subr.mxu1 %v2372_v0 }
  0xc5   : > { %v1636_v2 = vpop.permute.xlu1 %1635  ;;  %2100 = vmatpush1.msk.msra.mxu0 %vm324_vm1, %v1475_v1 }
  0xc6   : > { %2169 = vmatmul.mubr.msk.f32.vlgmr.msra.gmra.mrb[0].mxu1 %vm320_vm2, %v312_v63 }
  0xc7   : > { %v1634_v3 = vpop.permute.xlu0 %1633  ;;  %2101 = vmatmul.mubr.msk.f32.vlgmr.msra.gmra.mrb[0].mxu0 %vm320_vm2, %v312_v63  ;;  %2173 = vmatprep.mubr.msk.f32.mxu1 %vm2373_vm0, %v2372_v0 }
  0xc8   : > { %v1641_v4 = vsel %vm1639_vm10, %v1634_v3, %v1636_v2  ;;  %1716 = vmatprep.mubr.f32.mxu0 %v2372_v0 }
  0xc9   : > { %v1638_v5 = vpop.permute.xlu1 %1637  ;;  %2104 = vmatprep.subr.msk.mxu0 %vm324_vm1, %v1641_v4 }
  0xca   : > { %v1642_v6 = vsel %vm1639_vm10, %v1636_v2, %v1638_v5 }
  0xcb   : > { %2172 = vmatpush3.msk.msra.mxu1 %vm324_vm1, %v1642_v6  ;;  %v1632_v7 = vpop.permute.xlu0 %1631 }
  0xcc   : > { %v1640_v9 = vsel %vm1639_vm10, %v1632_v7, %v1634_v3 }
  0xcd   : > { %2105 = vmatpush1.msk.msra.mxu0 %vm324_vm1, %v1640_v9 }
  0xce   : > { %2174 = vmatmul.mubr.msk.f32.vlgmr.msra.gmra.mrb[0].mxu1 %vm320_vm2, %v313_v8 }
  0xcf   : > { %2106 = vmatmul.mubr.msk.f32.vlgmr.msra.gmra.mrb[0].mxu0 %vm320_vm2, %v313_v8 }
  0xda   : > { %v1815_v11 = vpop.permute.xlu1 %1814 }
  0xdc   : > { %v1806_v10 = vpop.permute.xlu0 %1805 }
 0x1a1   : > { %v1789_v0 = vpop.f32.mrb[0].mxu1 }
 0x1a2   : > { %v1810_v12 = vmul.f32 %v1806_v10, %v1789_v0  ;;  %v1718_v13 = vpop.f32.mrb[0].mxu0  ;;  %v2175_v14 = vpop.f32.mrb[1].mxu1 }
 0x1a3   : > { %v1808_v15 = vmul.f32 %v1806_v10, %v1718_v13  ;;  %v1720_v16 = vpop.f32.mrb[1].mxu0 }
 0x1a4   : > { %v2583_v17 = vadd.f32 %v1815_v11, %v1810_v12  ;;  %v1809_v18 = vmul.f32 %v1806_v10, %v1720_v16 }
 0x1a5   : > { %v2585_v19 = vadd.f32 %v1815_v11, %v1808_v15 }
 0x1a6   : > { %v2588_v20 = vmul.f32 0.70710677, %v2583_v17  ;;  %v2590_v21 = vadd.f32 %v1815_v11, %v1809_v18 }
 0x1a7   : > { %v2593_v22 = vmul.f32 0.70710677, %v2585_v19 }
 0x1a8   : > { %v1828_v23 = vand.u32 2147483647, %v2588_v20  ;;  %v2597_v24 = vmul.f32 0.70710677, %v2590_v21  ;;  %vm1888_vm11 = vcmp.lt.f32.partialorder %v2588_v20, 0.0 }
 0x1a9   : > { %v1826_v25 = vand.u32 2147483647, %v2593_v22  ;;  %vm1886_vm12 = vcmp.lt.f32.partialorder %v2593_v22, 0.0  ;;  %v1821_v22 = vmul.f32 0.5, %v2590_v21 }
 0x1aa   : > { %v1831_v26 = vmul.f32 0.3275911, %v1828_v23  ;;  %v1827_v27 = vand.u32 2147483647, %v2597_v24  ;;  %v1870_v33 = vmul.f32 %v1828_v23, %v1828_v23  ;;  %vm1887_vm13 = vcmp.lt.f32.partialorder %v2597_v24, 0.0 }
 0x1ab   : > { %v1829_v28 = vmul.f32 0.3275911, %v1826_v25  ;;  %v1868_v34 = vmul.f32 %v1826_v25, %v1826_v25 }
 0x1ac   : > { %v1834_v29 = vadd.f32 1.0, %v1831_v26  ;;  %v1830_v30 = vmul.f32 0.3275911, %v1827_v27  ;;  %v1873_v36 = vsub.f32 0.0, %v1870_v33  ;;  %v1869_v37 = vmul.f32 %v1827_v27, %v1827_v27 }
 0x1ad   : > { %v1832_v31 = vadd.f32 1.0, %v1829_v28  ;;  %v1871_v40 = vsub.f32 0.0, %v1868_v34  ;;  %v1822_v26 = vmul.f32 0.5, %v2583_v17 }
 0x1ae   : > { %2280 = vrcp.f32 %v1834_v29  ;;  %v1833_v32 = vadd.f32 1.0, %v1830_v30  ;;  %v1878_v45 = vmul.f32 1.442695, %v1873_v36  ;;  %v1872_v46 = vsub.f32 0.0, %v1869_v37 }
 0x1af   : > { %2282 = vrcp.f32 %v1832_v31  ;;  %v1874_v48 = vmul.f32 1.442695, %v1871_v40  ;;  %v1820_v29 = vmul.f32 0.5, %v2585_v19 }
 0x1b0   : > { %2284 = vrcp.f32 %v1833_v32  ;;  %v1876_v54 = vmul.f32 1.442695, %v1872_v46 }
 0x1b1   : > { %2286 = vpow2.f32 %v1878_v45 }
 0x1b2   : > { %2288 = vpow2.f32 %v1874_v48 }
 0x1b3   : > { %2290 = vpow2.f32 %v1876_v54 }
 0x1b8   : > { %v2281_v35 = vpop.eup %2280 }
 0x1b9   : > { %v2283_v38 = vpop.eup %2282  ;;  %v1843_v39 = vmul.f32 1.0614054, %v2281_v35 }
 0x1ba   : > { %v1841_v41 = vmul.f32 1.0614054, %v2283_v38  ;;  %v2285_v43 = vpop.eup %2284 }
 0x1bb   : > { %v1846_v42 = vadd.f32 -1.4531521, %v1843_v39  ;;  %v1842_v49 = vmul.f32 1.0614054, %v2285_v43  ;;  %v2287_v6 = vpop.eup %2286 }
 0x1bc   : > { %v1844_v44 = vadd.f32 -1.4531521, %v1841_v41  ;;  %v2289_v8 = vpop.eup %2288 }
 0x1bd   : > { %v1849_v47 = vmul.f32 %v2281_v35, %v1846_v42  ;;  %v1845_v52 = vadd.f32 -1.4531521, %v1842_v49  ;;  %v2291_v13 = vpop.eup %2290 }
 0x1be   : > { %v1847_v50 = vmul.f32 %v2283_v38, %v1844_v44 }
 0x1bf   : > { %v1852_v51 = vadd.f32 1.4214138, %v1849_v47  ;;  %v1848_v56 = vmul.f32 %v2285_v43, %v1845_v52 }
 0x1c0   : > { %v1850_v53 = vadd.f32 1.4214138, %v1847_v50 }
 0x1c1   : > { %v1855_v55 = vmul.f32 %v2281_v35, %v1852_v51  ;;  %v1851_v59 = vadd.f32 1.4214138, %v1848_v56 }
 0x1c2   : > { %v1853_v57 = vmul.f32 %v2283_v38, %v1850_v53 }
 0x1c3   : > { %v1858_v58 = vadd.f32 -0.28449672, %v1855_v55  ;;  %v1854_v62 = vmul.f32 %v2285_v43, %v1851_v59 }
 0x1c4   : > { %v1856_v60 = vadd.f32 -0.28449672, %v1853_v57 }
 0x1c5   : > { %v1861_v61 = vmul.f32 %v2281_v35, %v1858_v58  ;;  %v1857_v2 = vadd.f32 -0.28449672, %v1854_v62 }
 0x1c6   : > { %v1859_v63 = vmul.f32 %v2283_v38, %v1856_v60 }
 0x1c7   : > { %v1864_v1 = vadd.f32 0.2548296, %v1861_v61  ;;  %v1860_v5 = vmul.f32 %v2285_v43, %v1857_v2 }
 0x1c8   : > { %v1862_v3 = vadd.f32 0.2548296, %v1859_v63 }
 0x1c9   : > { %v1867_v4 = vmul.f32 %v2281_v35, %v1864_v1  ;;  %v1863_v10 = vadd.f32 0.2548296, %v1860_v5 }
 0x1ca   : > { %v1865_v7 = vmul.f32 %v2283_v38, %v1862_v3 }
 0x1cb   : > { %v1882_v9 = vmul.f32 %v2287_v6, %v1867_v4  ;;  %v1866_v12 = vmul.f32 %v2285_v43, %v1863_v10 }
 0x1cc   : > { %v1880_v0 = vmul.f32 %v2289_v8, %v1865_v7 }
 0x1cd   : > { %v1885_v11 = vsub.f32 1.0, %v1882_v9  ;;  %v1881_v16 = vmul.f32 %v2291_v13, %v1866_v12 }
 0x1ce   : > { %v1883_v14 = vsub.f32 1.0, %v1880_v0 }
 0x1cf   : > { %v1891_v15 = vsub.f32 0.0, %v1885_v11  ;;  %v1884_v25 = vsub.f32 1.0, %v1881_v16 }
 0x1d0   : > { %v1889_v18 = vsub.f32 0.0, %v1883_v14 }
 0x1d1   : > { %v1894_v23 = vsel %vm1888_vm11, %v1891_v15, %v1885_v11  ;;  %v1890_v31 = vsub.f32 0.0, %v1884_v25 }
 0x1d2   : > { %v1892_v27 = vsel %vm1886_vm12, %v1889_v18, %v1883_v14  ;;  %v1897_v28 = vadd.f32 1.0, %v1894_v23 }
 0x1d3   : > { %v1895_v30 = vadd.f32 1.0, %v1892_v27  ;;  %v1893_v33 = vsel %vm1887_vm13, %v1890_v31, %v1884_v25 }
 0x1d4   : > { %v1900_v32 = vmul.f32 %v1897_v28, %v1822_v26  ;;  %v1896_v17 = vadd.f32 1.0, %v1893_v33 }
 0x1d5   : > { %v1898_v20 = vmul.f32 %v1895_v30, %v1820_v29 }
 0x1d6   : > { %1903 = vst [vmem:[%s270_s9 + $0x10] sm:$0xff] %v1900_v32  ;;  %v1899_v34 = vmul.f32 %v1896_v17, %v1821_v22 }
 0x1d7   : > { %1901 = vst [vmem:[%s270_s9] sm:$0xff] %v1898_v20 }
 0x1d8   : > { %1902 = vst [vmem:[%s270_s9 + $0x8] sm:$0xff] %v1899_v34 }
 0x1d9   : > { %2305 = shalt.err (!%p2302_p5)
}
 0x1da   : > { %s2306_s26 = scalar_lea.hbm %s2614_s13, 384  ;;  %s2310_s5 = scalar_lea.hbm %s2667_s4, 768 }
 0x1db   : > { %p2307_p6 = scmp.ne.s32.totalorder %s2614_s13, %s2306_s26  ;;  %p2311_p10 = scmp.lt.u32.totalorder %s2614_s13, %s2667_s4 }
 0x1dc   : > { %p2312_p11 = scmp.lt.u32.totalorder %s2310_s5, %s2306_s26  ;;  %p2314_p13 = scmp.lt.u32.totalorder %s2306_s26, %s2614_s13 }
 0x1dd   : > { %p2308_p7 = pnand %p2307_p6, %p2449_p4 }
 0x1de   : > { %p2313_p12 = por %p2312_p11, %p2311_p10 }
 0x1df   : > { %p2309_p9 = pneg %p2308_p7 }
 0x1e0   : > { %p2315_p0 = por %p2314_p13, %p2313_p12 }
 0x1e2   : > { %p2316_p1 = pnand %p2315_p0, %p2309_p9 }
 0x1e4   : > { %2319 = shalt.err (!%p2316_p1)
}
 0x1e5   : > { %2210 = dma.vmem_to_hbm [thread:$0]  (%p2449_p4), %s2616_s10, 384, %s2614_s13, %s1905_s18  }
 0x1e6 PF: > { %p2216_p2 = scmp.ge.s32.totalorder %s2370_s20, 2  ;;  %s1933_s8 = sand.u32 1, %s2350_s15  }
 0x1e7   : > { %s1934_s9 = scalar_lea.sflag [#allocation4], %s1933_s8 }
 0x1e8   : > { %p2213_p3 = pnand %p2216_p2, %p2456_p8 }
 0x1ea   : > { %2345 = dma.done.wait (!%p2213_p3), %s1934_s9, 384  }
 0x1eb   : > { %2347 = vsyncadd (!%p2213_p3), %s1934_s9, 4294966912  ;;  %s17_s20 = sadd.s32 1, %s2370_s20   ;;  %s2670_s15 = smov %s2354_s16 }
 0x1ec   : > { %p14_p5 = scmp.ge.s32.totalorder %s17_s20, 4   ;;  %s2671_s16 = smov %s2358_s17 }
 0x1ed   : > { %s2672_s17 = smov %s2462_s28  ;;  %s2673_s18 = smov %s2366_s19 }
 0x1ee   : > { %s2674_s19 = smov %s2676_s23  ;;  %16 = sbr.rel (!%p14_p5) target bundleno = 4 (0x4), region = 88 }
 0x1f5   :  { %1939 = vsyncpa [#allocation4], 1 }
 0x1f6   :  { %1941 = vsyncpa [#allocation4 + $0x1], 1 }

</bundles_post_ra>
